<compile_context>
chip_gen: v7x
topology: tpu7x:2x2x1
jax: 0.10.0
libtpu: 0.0.40
codegen_flags: <defaults>
</compile_context>

<pallas_src>
import functools
import math

import jax
import jax.numpy as jnp
from jax.experimental import pallas as pl
from jax.experimental.pallas import tpu as pltpu

_VMEM_LIMIT = 32 * 1024 * 1024


# ---------------------------------------------------------------------------
# Kernels
# ---------------------------------------------------------------------------

def _layer_norm(x, gamma, beta, eps):
    # torch-style: mean, unbiased std (n-1), divide by (std + eps)
    mean = jnp.mean(x, axis=-1, keepdims=True)
    var = jnp.sum((x - mean) ** 2, axis=-1, keepdims=True) * (1.0 / (x.shape[-1] - 1))
    inv = pl.reciprocal(jnp.sqrt(var) + eps)          # exact reciprocal, then mul
    return gamma * (x - mean) * inv + beta


def _mha(q_in, kv_in, mask_i8, wq, bq, wk, bk, wv, bv, wo, bo, n_heads):
    """Multi-head attention on one (Tq, D) query tile vs a (Tk, D) kv block.

    Full-width projections (MXU-friendly K=N=D); heads handled with batched
    einsums.  All accumulation in f32.
    """
    Tq, D = q_in.shape
    Tk = kv_in.shape[0]
    d_k = D // n_heads
    scale = 1.0 / math.sqrt(d_k)

    q = jnp.dot(q_in, wq, preferred_element_type=jnp.float32) + bq    # (Tq, D)
    k = jnp.dot(kv_in, wk, preferred_element_type=jnp.float32) + bk   # (Tk, D)
    v = jnp.dot(kv_in, wv, preferred_element_type=jnp.float32) + bv   # (Tk, D)

    qh = (q * scale).reshape(Tq, n_heads, d_k)
    kh = k.reshape(Tk, n_heads, d_k)
    vh = v.reshape(Tk, n_heads, d_k)

    # scores[h, q, k] = sum_d qh[q,h,d] * kh[k,h,d]
    scores = jnp.einsum("qhd,khd->hqk", qh, kh,
                        preferred_element_type=jnp.float32)           # (h, Tq, Tk)

    # mask predicate evaluated once (int8 -> i32 unpack, compare, select)
    m = mask_i8.astype(jnp.int32)                                     # (Tq, Tk)
    scores = jnp.where(m[None, :, :] == 0, -1e9, scores)

    # numerically-stable softmax over Tk; divide -> EUP reciprocal + multiply
    scores = scores - jnp.max(scores, axis=-1, keepdims=True)
    p = jnp.exp(scores)
    p = p * pl.reciprocal(jnp.sum(p, axis=-1, keepdims=True), approx=True)

    ctx = jnp.einsum("hqk,khd->qhd", p, vh,
                     preferred_element_type=jnp.float32)              # (Tq, h, d_k)
    ctx = ctx.reshape(Tq, D)

    # concat(heads) @ Wo as one lane-dense (Tq, D) @ (D, D)
    return jnp.dot(ctx, wo, preferred_element_type=jnp.float32) + bo


def _self_attn_sublayer_kernel(x_ref, mask_ref,
                               wq_ref, bq_ref, wk_ref, bk_ref, wv_ref, bv_ref,
                               wo_ref, bo_ref, g_ref, bt_ref, o_ref,
                               *, n_heads, eps):
    # x_ref : (1, T, D)   mask_ref : (1, T, T) int8
    x = x_ref[0]                                        # (T, D)
    xn = _layer_norm(x, g_ref[...], bt_ref[...], eps)
    out = _mha(xn, xn, mask_ref[0],
               wq_ref[...], bq_ref[...], wk_ref[...], bk_ref[...],
               wv_ref[...], bv_ref[...], wo_ref[...], bo_ref[...], n_heads)
    # TODO(synk): dropout layers are treated as identity (eval / inference mode).
    o_ref[0] = (x + out).astype(o_ref.dtype)


def _cross_attn_sublayer_kernel(x_ref, mem_ref, mask_ref,
                                wq_ref, bq_ref, wk_ref, bk_ref, wv_ref, bv_ref,
                                wo_ref, bo_ref, g_ref, bt_ref, o_ref,
                                *, n_heads, eps):
    # x_ref : (1, tq, D)   mem_ref : (1, Tk, D)   mask_ref : (1, tq, Tk) int8
    x = x_ref[0]                                        # (tq, D)
    xn = _layer_norm(x, g_ref[...], bt_ref[...], eps)
    out = _mha(xn, mem_ref[0], mask_ref[0],
               wq_ref[...], bq_ref[...], wk_ref[...], bk_ref[...],
               wv_ref[...], bv_ref[...], wo_ref[...], bo_ref[...], n_heads)
    o_ref[0] = (x + out).astype(o_ref.dtype)


def _ffn_sublayer_kernel(x_ref, w1_ref, b1_ref, w2_ref, b2_ref,
                         g_ref, bt_ref, o_ref, *, eps):
    # x_ref: (TM, D)  w1_ref: (D, d_ff)  w2_ref: (d_ff, D)
    x = x_ref[...]
    xn = _layer_norm(x, g_ref[...], bt_ref[...], eps)
    h = jnp.dot(xn, w1_ref[...], preferred_element_type=jnp.float32) + b1_ref[...]
    h = jnp.maximum(h, 0.0)
    y = jnp.dot(h, w2_ref[...], preferred_element_type=jnp.float32) + b2_ref[...]
    o_ref[...] = (x + y).astype(o_ref.dtype)


# ---------------------------------------------------------------------------
# One-time parameter preparation (no per-call transposes, lane-dense weights)
# ---------------------------------------------------------------------------

def prepare_attention_params(torch_attn_params):
    """torch nn.Linear weights (out, in) -> pre-transposed (in, out) layout."""
    wq, bq, wk, bk, wv, bv, wo, bo = torch_attn_params
    return (wq.T, bq.reshape(1, -1), wk.T, bk.reshape(1, -1),
            wv.T, bv.reshape(1, -1), wo.T, bo.reshape(1, -1))


def prepare_ffn_params(torch_ffn_params):
    w1, b1, w2, b2 = torch_ffn_params                  # torch layout (out, in)
    return (w1.T, b1.reshape(1, -1), w2.T, b2.reshape(1, -1))


# ---------------------------------------------------------------------------
# pallas_call wrappers
# ---------------------------------------------------------------------------

def self_attention_sublayer(x, mask, attn_params, gamma, beta,
                            *, n_heads, eps=1e-6):
    """x = x + self_attn(LN(x), LN(x), LN(x), mask). Grid over batch only;
    x is passed once (no dead kv operand)."""
    B, T, D = x.shape
    wq, bq, wk, bk, wv, bv, wo, bo = attn_params
    mask_i8 = jnp.broadcast_to(mask, (B, T, T)).astype(jnp.int8)

    rep2 = lambda b: (0, 0)
    w_spec = pl.BlockSpec((D, D), rep2)
    b_spec = pl.BlockSpec((1, D), rep2)

    return pl.pallas_call(
        functools.partial(_self_attn_sublayer_kernel, n_heads=n_heads, eps=eps),
        out_shape=jax.ShapeDtypeStruct((B, T, D), x.dtype),
        grid_spec=pltpu.PrefetchScalarGridSpec(
            num_scalar_prefetch=0,
            grid=(B,),
            in_specs=[
                pl.BlockSpec((1, T, D), lambda b: (b, 0, 0)),     # x (residual + q/k/v)
                pl.BlockSpec((1, T, T), lambda b: (b, 0, 0)),     # mask (int8)
                w_spec, b_spec,                                   # Wq, bq
                w_spec, b_spec,                                   # Wk, bk
                w_spec, b_spec,                                   # Wv, bv
                w_spec, b_spec,                                   # Wo, bo
                b_spec, b_spec,                                   # LN gamma, beta
            ],
            out_specs=pl.BlockSpec((1, T, D), lambda b: (b, 0, 0)),
        ),
        compiler_params=pltpu.CompilerParams(
            dimension_semantics=("parallel",),
            vmem_limit_bytes=_VMEM_LIMIT),
    )(x, mask_i8, wq, bq, wk, bk, wv, bv, wo, bo, gamma, beta)


def cross_attention_sublayer(x, memory, mask, attn_params, gamma, beta,
                             *, n_heads, eps=1e-6, tile_q=128):
    """x = x + src_attn(LN(x), memory, memory, mask). Grid over (batch, Tq tiles)."""
    B, Tq, D = x.shape
    Tk = memory.shape[1]
    wq, bq, wk, bk, wv, bv, wo, bo = attn_params
    mask_i8 = jnp.broadcast_to(mask, (B, Tq, Tk)).astype(jnp.int8)

    tq = min(tile_q, Tq)
    pad = (-Tq) % tq
    if pad:                                  # padded query rows are fully masked
        x_p = jnp.pad(x, ((0, 0), (0, pad), (0, 0)))
        mask_p = jnp.pad(mask_i8, ((0, 0), (0, pad), (0, 0)))
    else:
        x_p, mask_p = x, mask_i8
    Tq_p = Tq + pad
    nq = Tq_p // tq

    rep2 = lambda b, q: (0, 0)
    w_spec = pl.BlockSpec((D, D), rep2)
    b_spec = pl.BlockSpec((1, D), rep2)

    out = pl.pallas_call(
        functools.partial(_cross_attn_sublayer_kernel, n_heads=n_heads, eps=eps),
        out_shape=jax.ShapeDtypeStruct((B, Tq_p, D), x.dtype),
        grid_spec=pltpu.PrefetchScalarGridSpec(
            num_scalar_prefetch=0,
            grid=(B, nq),
            in_specs=[
                pl.BlockSpec((1, tq, D), lambda b, q: (b, q, 0)),   # x tile
                pl.BlockSpec((1, Tk, D), lambda b, q: (b, 0, 0)),   # memory (per batch)
                pl.BlockSpec((1, tq, Tk), lambda b, q: (b, q, 0)),  # mask tile (int8)
                w_spec, b_spec,                                     # Wq, bq
                w_spec, b_spec,                                     # Wk, bk
                w_spec, b_spec,                                     # Wv, bv
                w_spec, b_spec,                                     # Wo, bo
                b_spec, b_spec,                                     # LN gamma, beta
            ],
            out_specs=pl.BlockSpec((1, tq, D), lambda b, q: (b, q, 0)),
        ),
        compiler_params=pltpu.CompilerParams(
            dimension_semantics=("parallel", "parallel"),
            vmem_limit_bytes=_VMEM_LIMIT),
    )(x_p, memory, mask_p, wq, bq, wk, bk, wv, bv, wo, bo, gamma, beta)

    if pad:
        out = out[:, :Tq]
    return out


def ffn_sublayer(x, ffn_params, gamma, beta, *, eps=1e-6, tile_m=256):
    w1, b1, w2, b2 = ffn_params          # w1: (D, d_ff), w2: (d_ff, D)
    orig_shape = x.shape
    D = orig_shape[-1]
    d_ff = w1.shape[1]

    x2d = x.reshape(-1, D)
    n_rows = x2d.shape[0]

    tm = min(tile_m, n_rows)
    if tm != n_rows and tm % 8 != 0:     # sublane alignment only when tiling
        tm = max(8, (tm // 8) * 8)
    pad = (-n_rows) % tm
    if pad:                              # pad copy only when rows don't divide tm
        x2d = jnp.pad(x2d, ((0, pad), (0, 0)))
    n_pad = x2d.shape[0]

    rep = lambda i: (0, 0)
    out = pl.pallas_call(
        functools.partial(_ffn_sublayer_kernel, eps=eps),
        out_shape=jax.ShapeDtypeStruct((n_pad, D), x.dtype),
        grid_spec=pltpu.PrefetchScalarGridSpec(
            num_scalar_prefetch=0,
            grid=(n_pad // tm,),
            in_specs=[
                pl.BlockSpec((tm, D), lambda i: (i, 0)),
                pl.BlockSpec((D, d_ff), rep), pl.BlockSpec((1, d_ff), rep),
                pl.BlockSpec((d_ff, D), rep), pl.BlockSpec((1, D), rep),
                pl.BlockSpec((1, D), rep), pl.BlockSpec((1, D), rep),
            ],
            out_specs=pl.BlockSpec((tm, D), lambda i: (i, 0)),
        ),
        compiler_params=pltpu.CompilerParams(
            dimension_semantics=("parallel",),
            vmem_limit_bytes=_VMEM_LIMIT),
    )(x2d, w1, b1, w2, b2, gamma, beta)

    if pad:
        out = out[:n_rows]
    return out.reshape(orig_shape)


def decoder_layer_forward(x, memory, src_mask, tgt_mask, params, *, n_heads):
    """Pallas forward of DecoderLayer (pre-norm residuals, dropout=identity)."""
    x = self_attention_sublayer(x, tgt_mask, params["self_attn"],
                                params["ln0_g"], params["ln0_b"], n_heads=n_heads)
    x = cross_attention_sublayer(x, memory, src_mask, params["src_attn"],
                                 params["ln1_g"], params["ln1_b"], n_heads=n_heads)
    x = ffn_sublayer(x, params["ffn"], params["ln2_g"], params["ln2_b"])
    return x


# ---------------------------------------------------------------------------
# Pure-JAX reference (mirrors the PyTorch module, dropout = identity)
# ---------------------------------------------------------------------------

def _ref_layer_norm(x, g, b, eps=1e-6):
    mean = x.mean(-1, keepdims=True)
    var = jnp.sum((x - mean) ** 2, -1, keepdims=True) / (x.shape[-1] - 1)
    return g * (x - mean) / (jnp.sqrt(var) + eps) + b


def _ref_mha(q_in, k_in, v_in, mask, p, n_heads):
    wq, bq, wk, bk, wv, bv, wo, bo = p   # torch layout (out, in)
    B, _, D = q_in.shape
    d_k = D // n_heads

    def proj(t, w, b):
        y = t @ w.T + b
        return y.reshape(B, -1, n_heads, d_k).transpose(0, 2, 1, 3)

    q, k, v = proj(q_in, wq, bq), proj(k_in, wk, bk), proj(v_in, wv, bv)
    scores = q @ k.transpose(0, 1, 3, 2) / math.sqrt(d_k)
    if mask is not None:
        scores = jnp.where(mask[:, None, :, :] == 0, -1e9, scores)
    p_attn = jax.nn.softmax(scores, axis=-1)
    ctx = (p_attn @ v).transpose(0, 2, 1, 3).reshape(B, -1, D)
    return ctx @ wo.T + bo


def decoder_layer_ref(x, memory, src_mask, tgt_mask, tp, n_heads):
    xn = _ref_layer_norm(x, tp["ln0_g"], tp["ln0_b"])
    x = x + _ref_mha(xn, xn, xn, tgt_mask, tp["self_attn"], n_heads)
    xn = _ref_layer_norm(x, tp["ln1_g"], tp["ln1_b"])
    x = x + _ref_mha(xn, memory, memory, src_mask, tp["src_attn"], n_heads)
    xn = _ref_layer_norm(x, tp["ln2_g"], tp["ln2_b"])
    w1, b1, w2, b2 = tp["ffn"]
    return x + (jnp.maximum(xn @ w1.T + b1, 0.0) @ w2.T + b2)


# ---------------------------------------------------------------------------
# Demo / correctness check
# ---------------------------------------------------------------------------

if __name__ == "__main__":
    key = jax.random.PRNGKey(0)
    B, T_tgt, T_src = 2, 8, 16
    d_model, n_heads, d_ff = 32, 4, 64

    keys = jax.random.split(key, 16)
    x = jax.random.normal(keys[0], (B, T_tgt, d_model), jnp.float32)
    memory = jax.random.normal(keys[1], (B, T_src, d_model), jnp.float32)

    # masks: causal for self-attn; source padding (batch 1 keeps only 12 tokens)
    causal = jnp.tril(jnp.ones((T_tgt, T_tgt), jnp.float32))
    tgt_mask = jnp.broadcast_to(causal, (B, T_tgt, T_tgt))
    src_valid = jnp.array([T_src, 12])
    src_mask = (jnp.arange(T_src)[None, :] < src_valid[:, None]).astype(jnp.float32)
    src_mask = jnp.broadcast_to(src_mask[:, None, :], (B, T_tgt, T_src))

    def linear(k, d_in, d_out):          # deterministic "nn.Linear" params
        kw, kb = jax.random.split(k)
        bound = 1.0 / math.sqrt(d_in)
        w = jax.random.uniform(kw, (d_out, d_in), jnp.float32, -bound, bound)
        b = jax.random.uniform(kb, (d_out,), jnp.float32, -bound, bound)
        return w, b

    sa = tuple(p for i in range(4) for p in linear(keys[2 + i], d_model, d_model))
    ca = tuple(p for i in range(4) for p in linear(keys[6 + i], d_model, d_model))
    w1, b1 = linear(keys[10], d_model, d_ff)
    w2, b2 = linear(keys[11], d_ff, d_model)

    torch_params = {"self_attn": sa, "src_attn": ca, "ffn": (w1, b1, w2, b2)}
    for i in range(3):
        kg, kb2 = jax.random.split(keys[12 + i])
        torch_params[f"ln{i}_g"] = 1.0 + 0.1 * jax.random.normal(kg, (d_model,), jnp.float32)
        torch_params[f"ln{i}_b"] = 0.1 * jax.random.normal(kb2, (d_model,), jnp.float32)

    # one-time conversion into kernel layout (no per-call transposes)
    kernel_params = {
        "self_attn": prepare_attention_params(torch_params["self_attn"]),
        "src_attn": prepare_attention_params(torch_params["src_attn"]),
        "ffn": prepare_ffn_params(torch_params["ffn"]),
    }
    for i in range(3):
        kernel_params[f"ln{i}_g"] = torch_params[f"ln{i}_g"].reshape(1, d_model)
        kernel_params[f"ln{i}_b"] = torch_params[f"ln{i}_b"].reshape(1, d_model)

    out = decoder_layer_forward(x, memory, src_mask, tgt_mask,
                                kernel_params, n_heads=n_heads)
    jax.block_until_ready(out)

    ref = decoder_layer_ref(x, memory, src_mask, tgt_mask,
                            torch_params, n_heads=n_heads)

    assert out.shape == (B, T_tgt, d_model)
    max_diff = float(jnp.max(jnp.abs(out - ref)))
    assert jnp.allclose(out, ref, atol=2e-2, rtol=2e-2), f"max abs diff {max_diff}"

    print("KERNEL_OK")
</pallas_src>

<mosaic_0001>
module attributes {stable_mosaic.version = 11 : i64} {
  func.func @_self_attn_sublayer_kernel(%arg0: i32, %arg1: memref<1x8x32xf32, #tpu.memory_space<vmem>>, %arg2: memref<1x8x8xi8, #tpu.memory_space<vmem>>, %arg3: memref<32x32xf32, #tpu.memory_space<vmem>>, %arg4: memref<1x32xf32, #tpu.memory_space<vmem>>, %arg5: memref<32x32xf32, #tpu.memory_space<vmem>>, %arg6: memref<1x32xf32, #tpu.memory_space<vmem>>, %arg7: memref<32x32xf32, #tpu.memory_space<vmem>>, %arg8: memref<1x32xf32, #tpu.memory_space<vmem>>, %arg9: memref<32x32xf32, #tpu.memory_space<vmem>>, %arg10: memref<1x32xf32, #tpu.memory_space<vmem>>, %arg11: memref<1x32xf32, #tpu.memory_space<vmem>>, %arg12: memref<1x32xf32, #tpu.memory_space<vmem>>, %arg13: memref<1x8x32xf32, #tpu.memory_space<vmem>>) attributes {dimension_semantics = [#tpu.dimension_semantics<parallel>], iteration_bounds = array<i64: 2>, scalar_prefetch = 0 : i64, scratch_operands = 0 : i64, tpu.core_type = #tpu.core_type<tc>, window_params = [{transform_indices = @transform_0, window_bounds = array<i64: 1, 8, 32>}, {transform_indices = @transform_1, window_bounds = array<i64: 1, 8, 8>}, {pipeline_mode = #tpu.pipeline_mode<synchronous>, transform_indices = @transform_2, window_bounds = array<i64: 32, 32>}, {pipeline_mode = #tpu.pipeline_mode<synchronous>, transform_indices = @transform_3, window_bounds = array<i64: 1, 32>}, {pipeline_mode = #tpu.pipeline_mode<synchronous>, transform_indices = @transform_4, window_bounds = array<i64: 32, 32>}, {pipeline_mode = #tpu.pipeline_mode<synchronous>, transform_indices = @transform_5, window_bounds = array<i64: 1, 32>}, {pipeline_mode = #tpu.pipeline_mode<synchronous>, transform_indices = @transform_6, window_bounds = array<i64: 32, 32>}, {pipeline_mode = #tpu.pipeline_mode<synchronous>, transform_indices = @transform_7, window_bounds = array<i64: 1, 32>}, {pipeline_mode = #tpu.pipeline_mode<synchronous>, transform_indices = @transform_8, window_bounds = array<i64: 32, 32>}, {pipeline_mode = #tpu.pipeline_mode<synchronous>, transform_indices = @transform_9, window_bounds = array<i64: 1, 32>}, {pipeline_mode = #tpu.pipeline_mode<synchronous>, transform_indices = @transform_10, window_bounds = array<i64: 1, 32>}, {pipeline_mode = #tpu.pipeline_mode<synchronous>, transform_indices = @transform_11, window_bounds = array<i64: 1, 32>}, {transform_indices = @transform_12, window_bounds = array<i64: 1, 8, 32>}]} {
    %c0 = arith.constant 0 : index
    %c0_0 = arith.constant 0 : index
    %c0_1 = arith.constant 0 : index
    %0 = vector.load %arg1[%c0, %c0_0, %c0_1] : memref<1x8x32xf32, #tpu.memory_space<vmem>>, vector<1x8x32xf32>
    %1 = vector.shape_cast %0 : vector<1x8x32xf32> to vector<8x32xf32>
    %c0_2 = arith.constant 0 : index
    %c0_3 = arith.constant 0 : index
    %2 = vector.load %arg11[%c0_2, %c0_3] : memref<1x32xf32, #tpu.memory_space<vmem>>, vector<1x32xf32>
    %c0_4 = arith.constant 0 : index
    %c0_5 = arith.constant 0 : index
    %3 = vector.load %arg12[%c0_4, %c0_5] : memref<1x32xf32, #tpu.memory_space<vmem>>, vector<1x32xf32>
    %cst = arith.constant dense<0.000000e+00> : vector<8xf32>
    %4 = vector.multi_reduction <add>, %1, %cst [1] : vector<8x32xf32> to vector<8xf32>
    %5 = vector.shape_cast %4 : vector<8xf32> to vector<8x1xf32>
    %cst_6 = arith.constant 3.200000e+01 : f32
    %6 = vector.broadcast %cst_6 : f32 to vector<8x1xf32>
    %7 = arith.divf %5, %6 : vector<8x1xf32>
    %8 = vector.broadcast %7 : vector<8x1xf32> to vector<8x32xf32>
    %9 = arith.subf %1, %8 : vector<8x32xf32>
    %10 = arith.mulf %9, %9 : vector<8x32xf32>
    %cst_7 = arith.constant dense<0.000000e+00> : vector<8xf32>
    %11 = vector.multi_reduction <add>, %10, %cst_7 [1] : vector<8x32xf32> to vector<8xf32>
    %12 = vector.shape_cast %11 : vector<8xf32> to vector<8x1xf32>
    %cst_8 = arith.constant 0.0322580636 : f32
    %13 = vector.broadcast %cst_8 : f32 to vector<8x1xf32>
    %14 = arith.mulf %12, %13 : vector<8x1xf32>
    %15 = math.sqrt %14 : vector<8x1xf32>
    %cst_9 = arith.constant 9.99999997E-7 : f32
    %16 = vector.broadcast %cst_9 : f32 to vector<8x1xf32>
    %17 = arith.addf %15, %16 : vector<8x1xf32>
    %18 = tpu.reciprocal %17 : vector<8x1xf32> -> vector<8x1xf32>
    %19 = vector.broadcast %7 : vector<8x1xf32> to vector<8x32xf32>
    %20 = arith.subf %1, %19 : vector<8x32xf32>
    %21 = vector.broadcast %2 : vector<1x32xf32> to vector<8x32xf32>
    %22 = arith.mulf %21, %20 : vector<8x32xf32>
    %23 = vector.broadcast %18 : vector<8x1xf32> to vector<8x32xf32>
    %24 = arith.mulf %22, %23 : vector<8x32xf32>
    %25 = vector.broadcast %3 : vector<1x32xf32> to vector<8x32xf32>
    %26 = arith.addf %24, %25 : vector<8x32xf32>
    %c0_10 = arith.constant 0 : index
    %c0_11 = arith.constant 0 : index
    %c0_12 = arith.constant 0 : index
    %27 = vector.load %arg2[%c0_10, %c0_11, %c0_12] : memref<1x8x8xi8, #tpu.memory_space<vmem>>, vector<1x8x8xi8>
    %28 = vector.shape_cast %27 : vector<1x8x8xi8> to vector<8x8xi8>
    %c0_13 = arith.constant 0 : index
    %c0_14 = arith.constant 0 : index
    %29 = vector.load %arg3[%c0_13, %c0_14] : memref<32x32xf32, #tpu.memory_space<vmem>>, vector<32x32xf32>
    %c0_15 = arith.constant 0 : index
    %c0_16 = arith.constant 0 : index
    %30 = vector.load %arg4[%c0_15, %c0_16] : memref<1x32xf32, #tpu.memory_space<vmem>>, vector<1x32xf32>
    %c0_17 = arith.constant 0 : index
    %c0_18 = arith.constant 0 : index
    %31 = vector.load %arg5[%c0_17, %c0_18] : memref<32x32xf32, #tpu.memory_space<vmem>>, vector<32x32xf32>
    %c0_19 = arith.constant 0 : index
    %c0_20 = arith.constant 0 : index
    %32 = vector.load %arg6[%c0_19, %c0_20] : memref<1x32xf32, #tpu.memory_space<vmem>>, vector<1x32xf32>
    %c0_21 = arith.constant 0 : index
    %c0_22 = arith.constant 0 : index
    %33 = vector.load %arg7[%c0_21, %c0_22] : memref<32x32xf32, #tpu.memory_space<vmem>>, vector<32x32xf32>
    %c0_23 = arith.constant 0 : index
    %c0_24 = arith.constant 0 : index
    %34 = vector.load %arg8[%c0_23, %c0_24] : memref<1x32xf32, #tpu.memory_space<vmem>>, vector<1x32xf32>
    %c0_25 = arith.constant 0 : index
    %c0_26 = arith.constant 0 : index
    %35 = vector.load %arg9[%c0_25, %c0_26] : memref<32x32xf32, #tpu.memory_space<vmem>>, vector<32x32xf32>
    %c0_27 = arith.constant 0 : index
    %c0_28 = arith.constant 0 : index
    %36 = vector.load %arg10[%c0_27, %c0_28] : memref<1x32xf32, #tpu.memory_space<vmem>>, vector<1x32xf32>
    %cst_29 = arith.constant dense<0.000000e+00> : vector<8x32xf32>
    %37 = tpu.matmul %26, %29, %cst_29 {dimension_numbers = #tpu.dot_dimension_numbers<[1], [0], [0], [1], [0, 0, 1, 1], [], []>} : vector<8x32xf32>, vector<32x32xf32>, vector<8x32xf32> -> vector<8x32xf32>
    %38 = vector.broadcast %30 : vector<1x32xf32> to vector<8x32xf32>
    %39 = arith.addf %37, %38 : vector<8x32xf32>
    %cst_30 = arith.constant dense<0.000000e+00> : vector<8x32xf32>
    %40 = tpu.matmul %26, %31, %cst_30 {dimension_numbers = #tpu.dot_dimension_numbers<[1], [0], [0], [1], [0, 0, 1, 1], [], []>} : vector<8x32xf32>, vector<32x32xf32>, vector<8x32xf32> -> vector<8x32xf32>
    %41 = vector.broadcast %32 : vector<1x32xf32> to vector<8x32xf32>
    %42 = arith.addf %40, %41 : vector<8x32xf32>
    %cst_31 = arith.constant dense<0.000000e+00> : vector<8x32xf32>
    %43 = tpu.matmul %26, %33, %cst_31 {dimension_numbers = #tpu.dot_dimension_numbers<[1], [0], [0], [1], [0, 0, 1, 1], [], []>} : vector<8x32xf32>, vector<32x32xf32>, vector<8x32xf32> -> vector<8x32xf32>
    %44 = vector.broadcast %34 : vector<1x32xf32> to vector<8x32xf32>
    %45 = arith.addf %43, %44 : vector<8x32xf32>
    %cst_32 = arith.constant 0.353553385 : f32
    %46 = vector.broadcast %cst_32 : f32 to vector<8x32xf32>
    %47 = arith.mulf %39, %46 : vector<8x32xf32>
    %48 = vector.shape_cast %47 : vector<8x32xf32> to vector<8x4x8xf32>
    %49 = vector.shape_cast %42 : vector<8x32xf32> to vector<8x4x8xf32>
    %50 = vector.shape_cast %45 : vector<8x32xf32> to vector<8x4x8xf32>
    "tpu.trace_start"() <{level = 10 : i32, message = "qhd,khd->hqk"}> : () -> ()
    %cst_33 = arith.constant dense<0.000000e+00> : vector<4x8x8xf32>
    %51 = tpu.matmul %48, %49, %cst_33 {dimension_numbers = #tpu.dot_dimension_numbers<[2], [2], [0], [0], [0, 1, 0, 0, 1, 0], [1], [1]>} : vector<8x4x8xf32>, vector<8x4x8xf32>, vector<4x8x8xf32> -> vector<4x8x8xf32>
    "tpu.trace_stop"() : () -> ()
    %52 = arith.extsi %28 : vector<8x8xi8> to vector<8x8xi32>
    %53 = vector.shape_cast %52 : vector<8x8xi32> to vector<1x8x8xi32>
    %c0_i32 = arith.constant 0 : i32
    %54 = vector.broadcast %c0_i32 : i32 to vector<1x8x8xi32>
    %55 = arith.cmpi eq, %53, %54 : vector<1x8x8xi32>
    %cst_34 = arith.constant -1.000000e+09 : f32
    %56 = vector.shape_cast %55 : vector<1x8x8xi1> to vector<1x8x8xi1>
    %57 = vector.broadcast %56 : vector<1x8x8xi1> to vector<4x8x8xi1>
    %58 = vector.broadcast %cst_34 : f32 to vector<4x8x8xf32>
    %59 = arith.select %57, %58, %51 : vector<4x8x8xi1>, vector<4x8x8xf32>
    %cst_35 = arith.constant dense<0xFF800000> : vector<4x8xf32>
    %60 = vector.multi_reduction <maximumf>, %59, %cst_35 [2] : vector<4x8x8xf32> to vector<4x8xf32>
    %61 = vector.shape_cast %60 : vector<4x8xf32> to vector<4x8x1xf32>
    %62 = vector.broadcast %61 : vector<4x8x1xf32> to vector<4x8x8xf32>
    %63 = arith.subf %59, %62 : vector<4x8x8xf32>
    %64 = math.exp %63 : vector<4x8x8xf32>
    %cst_36 = arith.constant dense<0.000000e+00> : vector<4x8xf32>
    %65 = vector.multi_reduction <add>, %64, %cst_36 [2] : vector<4x8x8xf32> to vector<4x8xf32>
    %66 = vector.shape_cast %65 : vector<4x8xf32> to vector<4x8x1xf32>
    %67 = tpu.reciprocal %66 {approx = true} : vector<4x8x1xf32> -> vector<4x8x1xf32>
    %68 = vector.broadcast %67 : vector<4x8x1xf32> to vector<4x8x8xf32>
    %69 = arith.mulf %64, %68 : vector<4x8x8xf32>
    "tpu.trace_start"() <{level = 10 : i32, message = "hqk,khd->qhd"}> : () -> ()
    %cst_37 = arith.constant dense<0.000000e+00> : vector<4x8x8xf32>
    %70 = tpu.matmul %50, %69, %cst_37 {dimension_numbers = #tpu.dot_dimension_numbers<[0], [2], [2], [1], [0, 1, 0, 2, 1, 1], [1], [0]>} : vector<8x4x8xf32>, vector<4x8x8xf32>, vector<4x8x8xf32> -> vector<4x8x8xf32>
    %71 = tpu.transpose %70, [2, 0, 1] : vector<4x8x8xf32> -> vector<8x4x8xf32>
    "tpu.trace_stop"() : () -> ()
    %72 = vector.shape_cast %71 : vector<8x4x8xf32> to vector<8x32xf32>
    %cst_38 = arith.constant dense<0.000000e+00> : vector<8x32xf32>
    %73 = tpu.matmul %72, %35, %cst_38 {dimension_numbers = #tpu.dot_dimension_numbers<[1], [0], [0], [1], [0, 0, 1, 1], [], []>} : vector<8x32xf32>, vector<32x32xf32>, vector<8x32xf32> -> vector<8x32xf32>
    %74 = vector.broadcast %36 : vector<1x32xf32> to vector<8x32xf32>
    %75 = arith.addf %73, %74 : vector<8x32xf32>
    %76 = arith.addf %1, %75 : vector<8x32xf32>
    %c0_39 = arith.constant 0 : index
    %c0_40 = arith.constant 0 : index
    %c0_41 = arith.constant 0 : index
    %77 = vector.load %arg13[%c0_39, %c0_40, %c0_41] : memref<1x8x32xf32, #tpu.memory_space<vmem>>, vector<1x8x32xf32>
    %78 = vector.shape_cast %77 : vector<1x8x32xf32> to vector<8x32xf32>
    %79 = vector.shape_cast %76 : vector<8x32xf32> to vector<1x8x32xf32>
    tpu.vector_store %arg13[%c0_39, %c0_40, %c0_41], %79 {strides = array<i32>} : memref<1x8x32xf32, #tpu.memory_space<vmem>>, vector<1x8x32xf32>,
    return
  }
  func.func @transform_0(%arg0: i32) -> (i32, i32, i32) {
    %c0_i32 = arith.constant 0 : i32
    %c0_i32_0 = arith.constant 0 : i32
    %c0_i32_1 = arith.constant 0 : i32
    return %arg0, %c0_i32, %c0_i32_0 : i32, i32, i32
  }
  func.func @transform_1(%arg0: i32) -> (i32, i32, i32) {
    %c0_i32 = arith.constant 0 : i32
    %c0_i32_0 = arith.constant 0 : i32
    %c0_i32_1 = arith.constant 0 : i32
    return %arg0, %c0_i32, %c0_i32_0 : i32, i32, i32
  }
  func.func @transform_2(%arg0: i32) -> (i32, i32) {
    %c0_i32 = arith.constant 0 : i32
    %c0_i32_0 = arith.constant 0 : i32
    %c0_i32_1 = arith.constant 0 : i32
    return %c0_i32, %c0_i32_0 : i32, i32
  }
  func.func @transform_3(%arg0: i32) -> (i32, i32) {
    %c0_i32 = arith.constant 0 : i32
    %c0_i32_0 = arith.constant 0 : i32
    %c0_i32_1 = arith.constant 0 : i32
    return %c0_i32, %c0_i32_0 : i32, i32
  }
  func.func @transform_4(%arg0: i32) -> (i32, i32) {
    %c0_i32 = arith.constant 0 : i32
    %c0_i32_0 = arith.constant 0 : i32
    %c0_i32_1 = arith.constant 0 : i32
    return %c0_i32, %c0_i32_0 : i32, i32
  }
  func.func @transform_5(%arg0: i32) -> (i32, i32) {
    %c0_i32 = arith.constant 0 : i32
    %c0_i32_0 = arith.constant 0 : i32
    %c0_i32_1 = arith.constant 0 : i32
    return %c0_i32, %c0_i32_0 : i32, i32
  }
  func.func @transform_6(%arg0: i32) -> (i32, i32) {
    %c0_i32 = arith.constant 0 : i32
    %c0_i32_0 = arith.constant 0 : i32
    %c0_i32_1 = arith.constant 0 : i32
    return %c0_i32, %c0_i32_0 : i32, i32
  }
  func.func @transform_7(%arg0: i32) -> (i32, i32) {
    %c0_i32 = arith.constant 0 : i32
    %c0_i32_0 = arith.constant 0 : i32
    %c0_i32_1 = arith.constant 0 : i32
    return %c0_i32, %c0_i32_0 : i32, i32
  }
  func.func @transform_8(%arg0: i32) -> (i32, i32) {
    %c0_i32 = arith.constant 0 : i32
    %c0_i32_0 = arith.constant 0 : i32
    %c0_i32_1 = arith.constant 0 : i32
    return %c0_i32, %c0_i32_0 : i32, i32
  }
  func.func @transform_9(%arg0: i32) -> (i32, i32) {
    %c0_i32 = arith.constant 0 : i32
    %c0_i32_0 = arith.constant 0 : i32
    %c0_i32_1 = arith.constant 0 : i32
    return %c0_i32, %c0_i32_0 : i32, i32
  }
  func.func @transform_10(%arg0: i32) -> (i32, i32) {
    %c0_i32 = arith.constant 0 : i32
    %c0_i32_0 = arith.constant 0 : i32
    %c0_i32_1 = arith.constant 0 : i32
    return %c0_i32, %c0_i32_0 : i32, i32
  }
  func.func @transform_11(%arg0: i32) -> (i32, i32) {
    %c0_i32 = arith.constant 0 : i32
    %c0_i32_0 = arith.constant 0 : i32
    %c0_i32_1 = arith.constant 0 : i32
    return %c0_i32, %c0_i32_0 : i32, i32
  }
  func.func @transform_12(%arg0: i32) -> (i32, i32, i32) {
    %c0_i32 = arith.constant 0 : i32
    %c0_i32_0 = arith.constant 0 : i32
    %c0_i32_1 = arith.constant 0 : i32
    return %arg0, %c0_i32, %c0_i32_0 : i32, i32, i32
  }
}

</mosaic_0001>

<bundles_post_ra>
// kernel: tpu_custom_call.1
= control target key start
LH: loop header
LB: loop body
LE: loop exit
PB: predicated region body
PF: predicated region fallthrough
CT: control target
= control target key end

     0   :  { %s3364_s0 = inlined_call_operand.hbm [shape: f32[2,8,32], index: 0, kind: input, shape index: {}]   ;;  %s3365_s1 = inlined_call_operand.hbm [shape: s8[2,8,8], index: 1, kind: input, shape index: {}]   ;;  %s3366_s2 = inlined_call_operand.hbm [shape: f32[32,32], index: 2, kind: input, shape index: {}]   ;;  %s3367_s3 = inlined_call_operand.vmem [shape: f32[1,32], index: 3, kind: input, shape index: {}]   ;;  %s3368_s4 = inlined_call_operand.hbm [shape: f32[32,32], index: 4, kind: input, shape index: {}]   ;;  %s3369_s5 = inlined_call_operand.vmem [shape: f32[1,32], index: 5, kind: input, shape index: {}]   ;;  %s3370_s6 = inlined_call_operand.hbm [shape: f32[32,32], index: 6, kind: input, shape index: {}]   ;;  %s3371_s7 = inlined_call_operand.vmem [shape: f32[1,32], index: 7, kind: input, shape index: {}]   ;;  %s3372_s8 = inlined_call_operand.hbm [shape: f32[32,32], index: 8, kind: input, shape index: {}]   ;;  %s3373_s9 = inlined_call_operand.vmem [shape: f32[1,32], index: 9, kind: input, shape index: {}]   ;;  %s3374_s10 = inlined_call_operand.vmem [shape: f32[1,32], index: 10, kind: input, shape index: {}]   ;;  %s3375_s11 = inlined_call_operand.vmem [shape: f32[1,32], index: 11, kind: input, shape index: {}]   ;;  %s3376_s12 = inlined_call_operand.hbm [shape: f32[2,8,32], index: 12, kind: output, shape index: {}]  }
   0x1   :  { %3382 = sst [smem:[#allocation20_spill]] %s3364_s0 }
   0x2   :  { %3383 = sst [smem:[#allocation21_spill]] %s3366_s2 }
   0x3   :  { %3384 = sst [smem:[#allocation22_spill]] %s3367_s3 }
   0x4   :  { %3385 = sst [smem:[#allocation23_spill]] %s3368_s4 }
   0x5   :  { %3386 = sst [smem:[#allocation24_spill]] %s3370_s6 }
   0x6   :  { %3387 = sst [smem:[#allocation25_spill]] %s3371_s7 }
   0x7   :  { %3388 = sst [smem:[#allocation26_spill]] %s3373_s9 }
   0x8   :  { %3389 = sst [smem:[#allocation27_spill]] %s3376_s12 }
   0x9   :  { %17 = vsyncpa [#allocation3], 0 }
   0xa   :  { %19 = vsyncpa [#allocation3 + $0x1], 0 }
   0xb   :  { %20 = vsyncpa [#allocation6], 0 }
   0xc   :  { %22 = vsyncpa [#allocation6 + $0x1], 0 }
   0xd   :  { %23 = vsyncpa [#allocation9], 0 }
   0xe   :  { %24 = vsyncpa [#allocation12], 0 }
   0xf   :  { %25 = vsyncpa [#allocation4], 0 }
  0x10   :  { %27 = vsyncpa [#allocation4 + $0x1], 0  ;;  %s2908_s21 = smov 0   ;;  %s2910_s22 = smov 0  }
  0x11   :  { %s2912_s23 = smov 0   ;;  %s2914_s24 = smov 0  }
  0x12 LB: > { %s2823_s25 = smov [#allocation7]   ;;  %s2929_s27 = sadd.s32 4294967295, %s2821_s24   ;;  %s2821_s24 = sphi %s2914_s24, %s3424_s24   ;;  %s2817_s23 = sphi %s2912_s23, %s3423_s23   ;;  %s2813_s22 = sphi %s2910_s22, %s3422_s22   ;;  %s2809_s21 = sphi %s2908_s21, %s3421_s21  }
  0x13   : > { %s338_s26 = sshll.u32 %s2823_s25, 4  ;;  %p2252_p0 = scmp.ge.s32.totalorder %s2821_s24, 1  ;;  %s2934_s26 = int_to_ptr.vmem [resolvable:$true] %s338_s26 }
  0x14   : > { %p3378_p1 = scmp.eq.s32.totalorder %s2929_s27, 0  ;;  %p326_p2 = scmp.lt.s32.totalorder %s2821_s24, 3 }
  0x15   : > { %s2824_s29 = smov [#allocation8]   ;;  %s2825_s14 = smov [#allocation10]  }
  0x16   : > { %p2936_p3 = pnand %p2252_p0, %p326_p2  ;;  %s354_s30 = sshll.u32 %s2824_s29, 4  ;;  %s2949_s30 = int_to_ptr.vmem [resolvable:$true] %s354_s30 }
  0x17   : > { %s370_s15 = sshll.u32 %s2825_s14, 4  ;;  %s3392_s2 = sld [smem:[#allocation21_spill]]  ;;  %s2951_s15 = int_to_ptr.vmem [resolvable:$true] %s370_s15 }
  0x18   : > { %s3390_s28 = scalar_select %p2936_p3, 1, 0 }
  0x19   : > { %p2464_p5 = pneg %p2936_p3 }
  0x1b   : > { %p2945_p6 = pnand %p2464_p5, %p3378_p1 }
  0x1d   : > { %s2567_s18 = scalar_lea.hbm %s3392_s2, 512  ;;  %p2961_p8 = pneg %p2945_p6 }
  0x1e   : > { %p2568_p7 = scmp.ne.s32.totalorder %s3392_s2, %s2567_s18  ;;  %p2574_p11 = scmp.lt.u32.totalorder %s2567_s18, %s3392_s2 }
  0x20   : > { %p2570_p9 = pnand %p2961_p8, %p2568_p7 }
  0x22   : > { %p2571_p10 = pneg %p2570_p9 }
  0x24   : > { %p2576_p12 = pnand %p2574_p11, %p2571_p10 }
  0x26   : > { %2579 = shalt.err (!%p2576_p12)
}
  0x27   : > { %s2580_s16 = scalar_lea.vmem %s2934_s26, 512  ;;  %p2588_p5 = scmp.lt.s32.totalorder %s2934_s26, %s2934_s26 }
  0x28   : > { %p2581_p13 = scmp.ne.s32.totalorder %s2934_s26, %s2580_s16  ;;  %p2589_p4 = scmp.lt.s32.totalorder %s2580_s16, %s2580_s16 }
  0x2a   : > { %p2583_p0 = pnand %p2581_p13, %p2961_p8  ;;  %p2590_p7 = por %p2589_p4, %p2588_p5 }
  0x2c   : > { %p2584_p2 = pneg %p2583_p0 }
  0x2e   : > { %p2591_p9 = pnand %p2590_p7, %p2584_p2 }
  0x30   : > { %2594 = shalt.err (!%p2591_p9)
}
  0x31   : > { %s2826_s17 = smov 128   ;;  %s2827_s18 = smov 8  }
  0x32   : > { %2467 = dma.hbm_to_vmem [thread:$0]  (!%p2945_p6), %s3392_s2, 512, %s2934_s26, [#allocation6], %s2826_s17, %s2826_s17, %s2827_s18  }
  0x33   : > { %s3394_s4 = sld [smem:[#allocation23_spill]] }
  0x39   : > { %s2595_s16 = scalar_lea.hbm %s3394_s4, 512 }
  0x3a   : > { %p2596_p4 = scmp.ne.s32.totalorder %s3394_s4, %s2595_s16  ;;  %p2602_p12 = scmp.lt.u32.totalorder %s2595_s16, %s3394_s4 }
  0x3c   : > { %p2598_p10 = pnand %p2596_p4, %p2961_p8 }
  0x3e   : > { %p2599_p11 = pneg %p2598_p10 }
  0x40   : > { %p2604_p13 = pnand %p2602_p12, %p2599_p11 }
  0x42   : > { %2607 = shalt.err (!%p2604_p13)
}
  0x43   : > { %s2608_s26 = scalar_lea.vmem %s2949_s30, 512  ;;  %p2616_p7 = scmp.lt.s32.totalorder %s2949_s30, %s2949_s30 }
  0x44   : > { %p2609_p0 = scmp.ne.s32.totalorder %s2949_s30, %s2608_s26  ;;  %p2617_p9 = scmp.lt.s32.totalorder %s2608_s26, %s2608_s26 }
  0x46   : > { %p2611_p2 = pnand %p2609_p0, %p2961_p8  ;;  %p2618_p4 = por %p2617_p9, %p2616_p7 }
  0x48   : > { %p2612_p5 = pneg %p2611_p2 }
  0x4a   : > { %p2619_p10 = pnand %p2618_p4, %p2612_p5 }
  0x4c   : > { %2622 = shalt.err (!%p2619_p10)
}
  0x4d   : > { %2470 = dma.hbm_to_vmem [thread:$0]  (!%p2945_p6), %s3394_s4, 512, %s2949_s30, [#allocation9], %s2826_s17, %s2826_s17, %s2827_s18  }
  0x4e   : > { %s3395_s6 = sld [smem:[#allocation24_spill]] }
  0x54   : > { %s2623_s19 = scalar_lea.hbm %s3395_s6, 512 }
  0x55   : > { %p2624_p11 = scmp.ne.s32.totalorder %s3395_s6, %s2623_s19  ;;  %p2630_p0 = scmp.lt.u32.totalorder %s2623_s19, %s3395_s6 }
  0x57   : > { %p2626_p12 = pnand %p2624_p11, %p2961_p8 }
  0x59   : > { %p2627_p13 = pneg %p2626_p12 }
  0x5b   : > { %p2632_p2 = pnand %p2630_p0, %p2627_p13 }
  0x5d   : > { %2635 = shalt.err (!%p2632_p2)
}
  0x5e   : > { %s2636_s30 = scalar_lea.vmem %s2951_s15, 512  ;;  %p2644_p4 = scmp.lt.s32.totalorder %s2951_s15, %s2951_s15 }
  0x5f   : > { %p2637_p5 = scmp.ne.s32.totalorder %s2951_s15, %s2636_s30  ;;  %p2645_p10 = scmp.lt.s32.totalorder %s2636_s30, %s2636_s30 }
  0x61   : > { %p2639_p7 = pnand %p2637_p5, %p2961_p8  ;;  %p2646_p11 = por %p2645_p10, %p2644_p4 }
  0x63   : > { %p2640_p9 = pneg %p2639_p7 }
  0x65   : > { %p2647_p12 = pnand %p2646_p11, %p2640_p9 }
  0x67   : > { %2650 = shalt.err (!%p2647_p12)
}
  0x68   : > { %2473 = dma.hbm_to_vmem [thread:$0]  (!%p2945_p6), %s3395_s6, 512, %s2951_s15, [#allocation9], %s2826_s17, %s2826_s17, %s2827_s18  }
  0x69   : > { %s2828_s7 = smov [#allocation11]   ;;  %s2651_s20 = scalar_lea.hbm %s3372_s8, 512 }
  0x6a   : > { %s386_s9 = sshll.u32 %s2828_s7, 4  ;;  %p2652_p13 = scmp.ne.s32.totalorder %s3372_s8, %s2651_s20  ;;  %s387_s9 = int_to_ptr.vmem [resolvable:$true] %s386_s9 }
  0x6b   : > { %p2658_p5 = scmp.lt.u32.totalorder %s2651_s20, %s3372_s8 }
  0x6c   : > { %p2654_p0 = pnand %p2652_p13, %p2961_p8 }
  0x6e   : > { %p2655_p2 = pneg %p2654_p0 }
  0x70   : > { %p2660_p7 = pnand %p2658_p5, %p2655_p2 }
  0x72   : > { %2663 = shalt.err (!%p2660_p7)
}
  0x73   : > { %s2664_s15 = scalar_lea.vmem %s387_s9, 512  ;;  %p2672_p11 = scmp.lt.s32.totalorder %s387_s9, %s387_s9 }
  0x74   : > { %p2665_p9 = scmp.ne.s32.totalorder %s387_s9, %s2664_s15  ;;  %p2673_p12 = scmp.lt.s32.totalorder %s2664_s15, %s2664_s15 }
  0x76   : > { %p2667_p4 = pnand %p2665_p9, %p2961_p8  ;;  %p2674_p1 = por %p2673_p12, %p2672_p11 }
  0x78   : > { %p2668_p10 = pneg %p2667_p4 }
  0x7a   : > { %p2675_p3 = pnand %p2674_p1, %p2668_p10 }
  0x7c   : > { %2678 = shalt.err (!%p2675_p3)
}
  0x7d   : > { %2476 = dma.hbm_to_vmem [thread:$0]  (!%p2945_p6), %s3372_s8, 512, %s387_s9, [#allocation12], %s2826_s17, %s2826_s17, %s2827_s18  }
  0x7e   : > { %s2251_s13 = sadd.s32 4294967294, %s2821_s24   ;;  %s3060_s25 = sadd.s32 1, %s2821_s24  }
  0x7f   : > { %s37_s7 = ssub.s32 %s2821_s24, %s3060_s25  ;;  %s40_s12 = sadd.s32 1, %s2817_s23 }
  0x80   : > { %p38_p1 = scmp.eq.s32.totalorder %s37_s7, 0  ;;  %p47_p3 = scmp.ne.s32.totalorder %s2817_s23, %s2813_s22 }
  0x81   : > { %p48_p8 = scmp.eq.s32.totalorder %s2821_s24, 0  ;;  %p53_p13 = scmp.ne.s32.totalorder %s2813_s22, %s2809_s21 }
  0x82   : > { %s3071_s19 = scalar_select %p38_p1, %s2817_s23, %s40_s12  }
  0x83   : > { %p3073_p0 = por %p48_p8, %p47_p3  ;;  %p3397_p2 = scmp.eq.s32.totalorder %s2929_s27, 0 }
  0x84   : > { %p313_p5 = scmp.eq.s32.totalorder %s2929_s27, 1  ;;  %p319_p7 = scmp.eq.s32.totalorder %s2251_s13, 1 }
  0x85   : > { %p3079_p6 = por %p3397_p2, %p53_p13  ;;  %p2492_p9 = scmp.lt.s32.totalorder %s2821_s24, 2 }
  0x86   : > { %s3086_s18 = sand.u32 1, %s2817_s23   ;;  %p3088_p4 = por %p313_p5, %p47_p3 }
  0x87   : > { %s3398_s17 = scalar_select %p3079_p6, 1, 0 }
  0x88   : > { %s3399_s9 = scalar_select %p3088_p4, 1, 0 }
  0x89   : > { %p3092_p10 = por %p319_p7, %p53_p13  ;;  %s2258_s14 = sshll.u32 %s3086_s18, 3 }
  0x8a   : > { %s2259_s16 = sshll.u32 %s2821_s24, 7  ;;  %s3401_s0 = sld [smem:[#allocation20_spill]] }
  0x8b   : > { %s3400_s29 = scalar_select %p3092_p10, 1, 0 }
  0x8c   : > { %s413_s3 = scalar_lea.vmem [#allocation2], %s2258_s14  ;;  %p3107_p11 = pnand %p2492_p9, %p3073_p0 }
  0x8d   : > { %s420_s13 = sshll.u32 %s413_s3, 4  ;;  %s2260_s2 = sshll.u32 %s3086_s18, 1  ;;  %s3103_s13 = int_to_ptr.vmem [resolvable:$true] %s420_s13 }
  0x8e   : > { %s410_s30 = scalar_lea.sflag [#allocation3], %s3086_s18  ;;  %p2681_p1 = pneg %p3107_p11 }
  0x90   : > { %s3101_s26 = scalar_lea.hbm %s3401_s0, %s2259_s16  ;;  %s2684_s20 = scalar_lea.hbm %s3401_s0, 256 }
  0x91   : > { %s2679_s16 = scalar_lea.hbm %s3101_s26, 128  ;;  %p2685_p13 = scmp.lt.u32.totalorder %s3101_s26, %s3401_s0 }
  0x92   : > { %p2680_p12 = scmp.ne.s32.totalorder %s3101_s26, %s2679_s16  ;;  %p2686_p0 = scmp.lt.u32.totalorder %s2684_s20, %s2679_s16 }
  0x93   : > { %p2688_p5 = scmp.lt.u32.totalorder %s2679_s16, %s3101_s26 }
  0x94   : > { %p2682_p3 = pnand %p2681_p1, %p2680_p12  ;;  %p2687_p2 = por %p2686_p0, %p2685_p13 }
  0x96   : > { %p2683_p8 = pneg %p2682_p3  ;;  %p2689_p7 = por %p2688_p5, %p2687_p2 }
  0x98   : > { %p2690_p9 = pnand %p2689_p7, %p2683_p8 }
  0x9a   : > { %2693 = shalt.err (!%p2690_p9)
}
  0x9b   : > { %s2694_s12 = scalar_lea.vmem %s3103_s13, 128  ;;  %s2829_s14 = smov [#allocation2]  }
  0x9c   : > { %p2695_p12 = scmp.ne.s32.totalorder %s3103_s13, %s2694_s12  ;;  %s2699_s15 = sshll.u32 %s2829_s14, 4  ;;  %s2700_s15 = int_to_ptr.vmem [resolvable:$false] %s2699_s15 }
  0x9d   : > { %s2701_s4 = scalar_lea.vmem %s2700_s15, 256  ;;  %p2702_p4 = scmp.lt.s32.totalorder %s3103_s13, %s2700_s15 }
  0x9e   : > { %p2697_p3 = pnand %p2695_p12, %p2681_p1  ;;  %p2703_p13 = scmp.lt.s32.totalorder %s2701_s4, %s2694_s12 }
  0xa0   : > { %p2698_p10 = pneg %p2697_p3  ;;  %p2704_p0 = por %p2703_p13, %p2702_p4 }
  0xa2   : > { %p2705_p2 = pnand %p2704_p0, %p2698_p10 }
  0xa4   : > { %2708 = shalt.err (!%p2705_p2)
}
  0xa5   : > { %2480 = dma.hbm_to_vmem [thread:$0]  (!%p3107_p11), %s3101_s26, 128, %s3103_s13, %s410_s30  }
  0xa6   : > { %s2261_s16 = sshll.u32 %s2821_s24, 5  ;;  %s431_s12 = scalar_lea.vmem [#allocation5], %s2260_s2 }
  0xa7   : > { %s3143_s14 = scalar_lea.hbm %s3365_s1, %s2261_s16  ;;  %s438_s15 = sshll.u32 %s431_s12, 4  ;;  %s439_s15 = int_to_ptr.vmem [resolvable:$true] %s438_s15 }
  0xa8   : > { %s3403_s4 = sand.u32 1, %s2821_s24   ;;  %s2709_s6 = scalar_lea.hbm %s3143_s14, 32 }
  0xa9   : > { %s428_s0 = scalar_lea.sflag [#allocation6], %s3403_s4  ;;  %p2710_p4 = scmp.ne.s32.totalorder %s3143_s14, %s2709_s6 }
  0xaa   : > { %s2714_s30 = scalar_lea.hbm %s3365_s1, 64  ;;  %p2715_p5 = scmp.lt.u32.totalorder %s3143_s14, %s3365_s1 }
  0xab   : > { %p2712_p10 = pnand %p2710_p4, %p2681_p1  ;;  %p2716_p7 = scmp.lt.u32.totalorder %s2714_s30, %s2709_s6 }
  0xac   : > { %p2718_p12 = scmp.lt.u32.totalorder %s2709_s6, %s3143_s14 }
  0xad   : > { %p2713_p8 = pneg %p2712_p10  ;;  %p2717_p9 = por %p2716_p7, %p2715_p5 }
  0xaf   : > { %p2719_p3 = por %p2718_p12, %p2717_p9 }
  0xb1   : > { %p2720_p13 = pnand %p2719_p3, %p2713_p8 }
  0xb3   : > { %2723 = shalt.err (!%p2720_p13)
}
  0xb4   : > { %s2724_s2 = scalar_lea.vmem %s439_s15, 32  ;;  %s2830_s20 = smov [#allocation5]  }
  0xb5   : > { %p2725_p0 = scmp.ne.s32.totalorder %s439_s15, %s2724_s2  ;;  %s2729_s3 = sshll.u32 %s2830_s20, 4  ;;  %s2730_s3 = int_to_ptr.vmem [resolvable:$false] %s2729_s3 }
  0xb6   : > { %s2731_s12 = scalar_lea.vmem %s2730_s3, 64  ;;  %p2732_p10 = scmp.lt.s32.totalorder %s439_s15, %s2730_s3 }
  0xb7   : > { %p2727_p2 = pnand %p2725_p0, %p2681_p1  ;;  %p2733_p6 = scmp.lt.s32.totalorder %s2731_s12, %s2724_s2 }
  0xb9   : > { %p2728_p4 = pneg %p2727_p2  ;;  %p2734_p5 = por %p2733_p6, %p2732_p10 }
  0xbb   : > { %p2735_p7 = pnand %p2734_p5, %p2728_p4 }
  0xbd   : > { %2738 = shalt.err (!%p2735_p7)
}
  0xbe   : > { %2483 = dma.hbm_to_vmem [thread:$0]  (!%p3107_p11), %s3143_s14, 32, %s439_s15, %s428_s0  }
  0xbf   : > { %p3404_p8 = scmp.ne.s32.totalorder %s3390_s28, 0 }
  0xc0   : > { %s3171_s6 = sand.u32 (!%p3404_p8), 1, %s2813_s22   ;;  %p3405_p6 = scmp.ne.s32.totalorder (!%p3404_p8), %s3398_s17, 0 }
  0xc1   : > { %447 = sbr.rel (%p3404_p8) target bundleno = 2272 (0x8e0), region = 68  ;;  %s2263_s4 = sshll.u32 (!%p3404_p8), %s3171_s6, 3 }
  0xc2   : > { %s450_s26 = scalar_lea.sflag (!%p3404_p8), [#allocation3], %s3171_s6  ;;  %s453_s13 = scalar_lea.vmem (!%p3404_p8), [#allocation2], %s2263_s4 }
  0xc8   : > { %2784 = dma.done.wait (%p3405_p6), %s450_s26, 128  }
  0xc9   : > { %2786 = vsyncadd (%p3405_p6), %s450_s26, 4294967168  ;;  %s458_s0 = sand.u32 1, %s2929_s27   ;;  %s2264_s28 = sshll.u32 %s3171_s6, 1 }
  0xca   : > { %s459_s7 = scalar_lea.sflag [#allocation6], %s458_s0  ;;  %s3183_s14 = scalar_lea.vmem [#allocation5], %s2264_s28 }
  0xcb   : > { %2788 = dma.done.wait (%p3405_p6), %s459_s7, 32  }
  0xcc   : > { %2790 = vsyncadd (%p3405_p6), %s459_s7, 4294967264  ;;  %p3406_p11 = scmp.eq.s32.totalorder %s2929_s27, 0 }
  0xce   : > { %2792 = dma.done.wait (%p3406_p11), [#allocation6], 512   ;;  %p3407_p1 = pmov %p3406_p11 }
  0xd0   : > { %2794 = vsyncadd (%p3407_p1), [#allocation6], 4294966784  ;;  %p3408_p9 = pmov %p3407_p1 }
  0xd1   : > { %p3409_p12 = pmov %p3407_p1 }
  0xd2   : > { %2796 = dma.done.wait (%p3408_p9), [#allocation9], 1024  }
  0xd3   : > { %2798 = vsyncadd (%p3409_p12), [#allocation9], 4294966272  ;;  %p3410_p3 = pmov %p3407_p1 }
  0xd4   : > { %p3411_p13 = pmov %p3407_p1 }
  0xd5   : > { %2800 = dma.done.wait (%p3410_p3), [#allocation12], 512  }
  0xd6   : > { %2802 = vsyncadd (%p3411_p13), [#allocation12], 4294966784  ;;  %vm527_vm0 = vcmask 261120   ;;  %v3201_v0 = vld [vmem:[%s453_s13] sm:$0xff]  ;;  %v564_v7 = vld [vmem:[#allocation7] sm:$0xff]  ;;  %v2831_v10 = vmov 0.0|0.0  }
  0xd7   : > { %v528_v1 = vsel %vm527_vm0, %v3201_v0, 0.0  ;;  %v565_v8 = vld [vmem:[#allocation7 + $0x8] sm:$0xff]  ;;  %v569_v9 = vld [vmem:[#allocation8] sm:$0xff]  ;;  %2418 = vmatprep.subr.bf16.mxu0 %v2831_v10  ;;  %2424 = vmatprep.subr.bf16.mxu1 %v2831_v10  ;;  %v566_v13 = vld [vmem:[#allocation7 + $0x10] sm:$0xff]  ;;  %vm2832_vm1 = vmmov 0   ;;  %v2833_v18 = vmov 0.0  }
  0xd8   : > { %529 = vadd.xlane.f32.xlu0 %v528_v1  ;;  %v2419_v11 = vpack.c.bf16 %v565_v8, %v564_v7  ;;  %v570_v12 = vld [vmem:[#allocation8 + $0x8] sm:$0xff]  ;;  %v567_v14 = vld [vmem:[#allocation7 + $0x18] sm:$0xff]  ;;  %v571_v16 = vld [vmem:[#allocation8 + $0x10] sm:$0xff]  ;;  %2342 = vmatprep.mubr.msk.f32.mxu0 %vm2832_vm1, %v2833_v18  ;;  %s2834_s20 = smov 104   ;;  %s2835_s3 = smov 120   ;;  %vm971_vm4 = vcmask 64512  }
  0xd9   : > { %v2425_v15 = vpack.c.bf16 %v570_v12, %v569_v9  ;;  %v572_v17 = vld [vmem:[#allocation8 + $0x18] sm:$0xff]  ;;  %2353 = vmatprep.mubr.msk.f32.mxu1 %vm2832_vm1, %v2833_v18  ;;  %v2422_v19 = vpack.c.bf16 %v567_v14, %v566_v13  ;;  %v2270_v29 = vld [vmem:[%s3374_s10] ss:$0 sm:$0xff]  ;;  %v574_v31 = vld [vmem:[#allocation10] sm:$0xff]  ;;  %s2836_s12 = smov 112   ;;  %s3412_s0 = sld [smem:[#allocation22_spill]] }
  0xda   : > { %2420 = vmatpush3.bf16.msra.mxu0 %v2419_v11  ;;  %v2428_v20 = vpack.c.bf16 %v572_v17, %v571_v16  ;;  %v575_v32 = vld [vmem:[#allocation10 + $0x8] sm:$0xff]  ;;  %v576_v38 = vld [vmem:[#allocation10 + $0x10] sm:$0xff]  ;;  %v577_v39 = vld [vmem:[#allocation10 + $0x18] sm:$0xff]  ;;  %s3415_s17 = sld [smem:[#allocation25_spill]]  ;;  %s2840_s15 = smov 8   ;;  %vm2021_vm6 = vcmask 130048  }
  0xdb   : > { %2426 = vmatpush3.bf16.msra.mxu1 %v2425_v15  ;;  %2421 = vmatprep.subr.bf16.mxu0 %v2831_v10  ;;  %v2271_v34 = vld [vmem:[%s3375_s11] ss:$0 sm:$0xff]  ;;  %v2431_v36 = vpack.c.bf16 %v575_v32, %v574_v31  ;;  %v2434_v40 = vpack.c.bf16 %v577_v39, %v576_v38  ;;  %v563_v62 = vld [vmem:[%s3183_s14] sm:$0x3]  ;;  %s2839_s14 = smov 16   ;;  %s2841_s30 = smov 24  }
  0xdc   : > { %2427 = vmatprep.subr.bf16.mxu1 %v2831_v10  ;;  %v2274_v41 = vld [vmem:[%s3369_s5] ss:$0 sm:$0xff]  ;;  %v1260_v63 = vunpack.c.0.s8 %v563_v62  ;;  %vm2023_vm7 = vcmask 195584   ;;  %s3416_s2 = sld [smem:[#allocation26_spill]]  ;;  %p3418_p2 = scmp.ne.s32.totalorder %s3399_s9, 0 }
  0xde   : > { %2423 = vmatpush3.bf16.msra.mxu0 %v2422_v19  ;;  %vm3263_vm5 = vcmp.eq.s32.totalorder %v1260_v63, 0 }
  0xdf   : > { %2429 = vmatpush3.bf16.msra.mxu1 %v2428_v20  ;;  %2430 = vmatprep.subr.bf16.mxu0 %v2831_v10  ;;  %v2272_v49 = vld [vmem:[%s3412_s0] ss:$0 sm:$0xff]  ;;  %s3417_s0 = sld [smem:[#allocation27_spill]] }
  0xe0   : > { %2367 = vmatprep.subr.mxu1 %v2833_v18 }
 0x165   : > { %v530_v2 = vpop.xlane.xlu0 %529 }
 0x166   : > { %v532_v3 = vmul.f32 0.03125, %v530_v2 }
 0x168   : > { %v533_v4 = vsub.f32 %v3201_v0, %v532_v3 }
 0x16a   : > { %v534_v5 = vmul.f32 %v533_v4, %v533_v4  ;;  %v554_v30 = vmul.f32 %v2270_v29, %v533_v4 }
 0x16c   : > { %v535_v6 = vsel %vm527_vm0, %v534_v5, 0.0 }
 0x16d   : > { %536 = vadd.xlane.f32.xlu0 %v535_v6  ;;  %v2276_v6 = vld [vmem:[%s3415_s17] ss:$0 sm:$0xff] }
 0x1fa   : > { %v537_v21 = vpop.xlane.xlu0 %536 }
 0x1fb   : > { %v538_v22 = vmul.f32 0.032258064, %v537_v21 }
 0x1fd   : > { %2547 = vrsqrt.f32 %v538_v22  ;;  %vm541_vm2 = vcmp.eq.f32.partialorder %v538_v22, inf  ;;  %v544_v25 = vand.u32 2147483648, %v538_v22  ;;  %vm543_vm3 = vcmp.eq.f32.partialorder %v538_v22, 0.0 }
 0x207   : > { %v2548_v23 = vpop.eup %2547 }
 0x208   : > { %v540_v24 = vmul.f32 %v2548_v23, %v538_v22 }
 0x20a   : > { %v542_v26 = vsel %vm541_vm2, %v538_v22, %v540_v24 }
 0x20b   : > { %v545_v27 = vsel %vm543_vm3, %v544_v25, %v542_v26 }
 0x20c   : > { %v546_v28 = vadd.f32 1e-06, %v545_v27 }
 0x20e   : > { %2549 = vrcp.f32 %v546_v28 }
 0x218   : > { %v2550_v33 = vpop.eup %2549 }
 0x219   : > { %v555_v35 = vmul.f32 %v2550_v33, %v554_v30 }
 0x21b   : > { %v562_v37 = vadd.f32 %v2271_v34, %v555_v35 }
 0x21d   : > { %2343 = vmatmul.mubr.msk.f32.vlgmr.msra.gmra.mrb[0].mxu0 %vm527_vm0, %v562_v37  ;;  %2354 = vmatmul.mubr.msk.f32.vlgmr.msra.gmra.mrb[0].mxu1 %vm527_vm0, %v562_v37 }
 0x21e   : > { %2432 = vmatpush3.bf16.msra.mxu0 %v2431_v36  ;;  %2364 = vmatprep.mubr.msk.f32.mxu0 %vm2832_vm1, %v2833_v18 }
 0x21f   : > { %2433 = vmatprep.subr.bf16.mxu0 %v2831_v10  ;;  %2369 = vmatprep.mubr.msk.f32.mxu1 %vm2832_vm1, %v2833_v18 }
 0x222   : > { %2435 = vmatpush3.bf16.msra.mxu0 %v2434_v40 }
 0x223   : > { %2387 = vmatprep.subr.mxu0 %v2833_v18 }
 0x225   : > { %2365 = vmatmul.mubr.msk.f32.vlgmr.msra.gmra.mrb[2].mxu0 %vm527_vm0, %v562_v37 }
 0x226   : > { %2389 = vmatprep.mubr.msk.f32.mxu0 %vm2832_vm1, %v2833_v18 }
 0x2f0   : > { %v659_v42 = vpop.f32.mrb[0].mxu0  ;;  %v735_v43 = vpop.f32.mrb[0].mxu1 }
 0x2f1   : > { %v736_v44 = vadd.f32 %v2274_v41, %v735_v43  ;;  %v2344_v45 = vpop.f32.mrb[1].mxu0  ;;  %v2355_v46 = vpop.f32.mrb[1].mxu1  ;;  %v660_v50 = vadd.f32 %v2272_v49, %v659_v42 }
 0x2f3   : > { %830 = vrot.lane.b32.xlu0 %v736_v44, %s2834_s20  ;;  %824 = vrot.lane.b32.xlu1 %v736_v44, %s2835_s3  ;;  %v815_v51 = vmul.f32 0.35355338, %v660_v50 }
 0x2f7   : > { %827 = vrot.lane.b32.xlu1 %v736_v44, %s2836_s12 }
 0x2f8   : > { %v811_v47 = vpop.f32.mrb[2].mxu0 }
 0x2f9   : > { %v2366_v48 = vpop.f32.mrb[3].mxu0  ;;  %v812_v7 = vadd.f32 %v2276_v6, %v811_v47  ;;  %v579_v6 = vld [vmem:[#allocation11] sm:$0xff] }
 0x320   : > { %843 = vxpose.xlu1.b32.start.end [1/1] (short) (narrow) %v736_v44, 8 }
 0x33e   : > { %817 = vrot.lane.b32.xlu1 %v815_v51, %s2835_s3 }
 0x342   : > { %819 = vrot.lane.b32.xlu1 %v815_v51, %s2836_s12 }
 0x346   : > { %821 = vrot.lane.b32.xlu1 %v815_v51, %s2834_s20 }
 0x365   : > { %v825_v52 = vpop.permute.xlu1 %824  ;;  %v831_v54 = vpop.permute.xlu0 %830 }
 0x366   : > { %875 = vxpose.xlu0.b32.start.end [1/1] (short) (narrow) %v825_v52, 8 }
 0x369   : > { %v828_v53 = vpop.permute.xlu1 %827 }
 0x36a   : > { %907 = vxpose.xlu0.b32.start.end [1/1] (short) (narrow) %v828_v53, 8 }
 0x36f   : > { %939 = vxpose.xlu1.b32.start.end [1/1] (short) (narrow) %v831_v54, 8 }
 0x3a0   : > { %v859_v55 = vpop.trf.xlu1 }
 0x3a1   : > { %2368 = vmatpush3.msra.mxu1 %v859_v55 }
 0x3a2   : > { %2370 = vmatmul.mubr.msk.f32.vlgmr.msra.gmra.mrb[2].mxu1 %vm971_vm4, %v815_v51  ;;  %2372 = vmatprep.subr.mxu1 %v2833_v18 }
 0x3a3   : > { %2374 = vmatprep.mubr.msk.f32.mxu1 %vm2832_vm1, %v2833_v18 }
 0x3b0   : > { %v818_v56 = vpop.permute.xlu1 %817 }
 0x3b4   : > { %v820_v57 = vpop.permute.xlu1 %819 }
 0x3b8   : > { %v822_v60 = vpop.permute.xlu1 %821 }
 0x3e6   : > { %v891_v58 = vpop.trf.xlu0 }
 0x3e7   : > { %2373 = vmatpush3.msra.mxu1 %v891_v58 }
 0x3e8   : > { %2375 = vmatmul.mubr.msk.f32.vlgmr.msra.gmra.mrb[4].mxu1 %vm971_vm4, %v818_v56  ;;  %2377 = vmatprep.subr.mxu1 %v2833_v18 }
 0x3e9   : > { %2379 = vmatprep.mubr.msk.f32.mxu1 %vm2832_vm1, %v2833_v18 }
 0x3ea   : > { %v923_v59 = vpop.trf.xlu0 }
 0x3eb   : > { %2378 = vmatpush3.msra.mxu1 %v923_v59 }
 0x3ec   : > { %2380 = vmatmul.mubr.msk.f32.vlgmr.msra.gmra.mrb[6].mxu1 %vm971_vm4, %v820_v57  ;;  %2382 = vmatprep.subr.mxu1 %v2833_v18 }
 0x3ed   : > { %2384 = vmatprep.mubr.msk.f32.mxu1 %vm2832_vm1, %v2833_v18 }
 0x3ef   : > { %v955_v61 = vpop.trf.xlu1 }
 0x3f0   : > { %2383 = vmatpush3.msra.mxu1 %v955_v61 }
 0x3f1   : > { %2385 = vmatmul.mubr.msk.f32.vlgmr.msra.gmra.mrb[8].mxu1 %vm971_vm4, %v822_v60  ;;  %2392 = vmatprep.subr.mxu1 %v2833_v18 }
 0x3f2   : > { %2394 = vmatprep.mubr.msk.f32.mxu1 %vm2832_vm1, %v2833_v18 }
 0x475   : > { %v1040_v2 = vpop.f32.mrb[2].mxu1 }
 0x476   : > { %v1264_v3 = vsel %vm3263_vm5, -1e+09, %v1040_v2  ;;  %v2371_v4 = vpop.f32.mrb[3].mxu1 }
 0x477   : > { %v1268_v5 = vsel %vm971_vm4, %v1264_v3, -inf }
 0x478   : > { %1269 = vmax.xlane.f32.xlu0 %v1268_v5 }
 0x48e   : > { %834 = vrot.lane.b32.xlu0 %v812_v7, %s2835_s3  ;;  %s523_s3 = scalar_lea.vmem [#allocation13], %s2263_s4  ;;  %s2842_s4 = smov [#allocation13]  }
 0x48f   : > { %s2743_s17 = sshll.u32 %s2842_s4, 4  ;;  %s2744_s17 = int_to_ptr.vmem [resolvable:$false] %s2743_s17 }
 0x4bb   : > { %v1112_v8 = vpop.f32.mrb[4].mxu1 }
 0x4bc   : > { %v1265_v9 = vsel %vm3263_vm5, -1e+09, %v1112_v8  ;;  %v2376_v11 = vpop.f32.mrb[5].mxu1 }
 0x4bd   : > { %v1271_v12 = vsel %vm971_vm4, %v1265_v9, -inf }
 0x4be   : > { %1272 = vmax.xlane.f32.xlu1 %v1271_v12  ;;  %v1877_v12 = vlaneseq }
 0x4bf   : > { %v1184_v13 = vpop.f32.mrb[6].mxu1 }
 0x4c0   : > { %v1266_v14 = vsel %vm3263_vm5, -1e+09, %v1184_v13  ;;  %v2381_v15 = vpop.f32.mrb[7].mxu1 }
 0x4c1   : > { %v1274_v16 = vsel %vm971_vm4, %v1266_v14, -inf }
 0x4c2   : > { %1275 = vmax.xlane.f32.xlu1 %v1274_v16 }
 0x4c4   : > { %v1256_v17 = vpop.f32.mrb[8].mxu1 }
 0x4c5   : > { %v1267_v19 = vsel %vm3263_vm5, -1e+09, %v1256_v17  ;;  %v2386_v20 = vpop.f32.mrb[9].mxu1  ;;  %v1878_v17 = vshrl.u32 %v1877_v12, 7 }
 0x4c6   : > { %v1277_v21 = vsel %vm971_vm4, %v1267_v19, -inf }
 0x4c7   : > { %1278 = vmax.xlane.f32.xlu1 %v1277_v21 }
 0x4d8   : > { %837 = vrot.lane.b32.xlu1 %v812_v7, %s2836_s12  ;;  %s2120_s12 = sshll.u32 %s523_s3, 4  ;;  %s3321_s12 = int_to_ptr.vmem [resolvable:$true] %s2120_s12 }
 0x4d9   : > { %s2739_s7 = scalar_lea.vmem %s3321_s12, 128  ;;  %p2746_p5 = scmp.lt.s32.totalorder %s3321_s12, %s2744_s17 }
 0x4da   : > { %p2740_p0 = scmp.ne.s32.totalorder %s3321_s12, %s2739_s7 }
 0x4dc   : > { %840 = vrot.lane.b32.xlu1 %v812_v7, %s2834_s20  ;;  %s2295_s20 = sshll.u32 %s2929_s27, 7  ;;  %s2107_s27 = scalar_lea.sflag [#allocation4], %s3171_s6 }
 0x4dd   : > { %s3319_s28 = scalar_lea.hbm %s3417_s0, %s2295_s20  ;;  %p2741_p4 = pnand %p2740_p0, %p3418_p2 }
 0x4df   : > { %p2742_p10 = pneg %p2741_p4 }
 0x505   : > { %v1270_v22 = vpop.xlane.xlu0 %1269 }
 0x506   : > { %v1280_v23 = vsub.f32 %v1264_v3, %v1270_v22 }
 0x508   : > { %v1284_v24 = vmul.f32 1.442695, %v1280_v23 }
 0x509   : > { %v835_v42 = vpop.permute.xlu0 %834 }
 0x50a   : > { %2551 = vpow2.f32 %v1284_v24 }
 0x514   : > { %v2552_v25 = vpop.eup %2551 }
 0x515   : > { %v1292_v26 = vsel %vm971_vm4, %v2552_v25, 0.0 }
 0x516   : > { %1293 = vadd.xlane.f32.xlu0 %v1292_v26 }
 0x54b   : > { %v1273_v27 = vpop.xlane.xlu1 %1272 }
 0x54c   : > { %v1281_v28 = vsub.f32 %v1265_v9, %v1273_v27  ;;  %v2837_v9 = vmov 1983009808  }
 0x54d   : > { %v1875_v11 = vunpack.c.l.s4 %v2837_v9 }
 0x54e   : > { %v1286_v29 = vmul.f32 1.442695, %v1281_v28 }
 0x54f   : > { %v1276_v30 = vpop.xlane.xlu1 %1275  ;;  %v1876_v16 = vunpack.c.0.s8 %v1875_v11 }
 0x550   : > { %2553 = vpow2.f32 %v1286_v29  ;;  %v1282_v31 = vsub.f32 %v1266_v14, %v1276_v30  ;;  %v2838_v14 = vmov 1934713408  }
 0x551   : > { %v1907_v15 = vunpack.c.l.s4 %v2838_v14  ;;  %v1879_v21 = vsub.s32 %v1876_v16, %v1878_v17 }
 0x552   : > { %v1288_v32 = vmul.f32 1.442695, %v1282_v31 }
 0x553   : > { %v1908_v20 = vunpack.c.0.s8 %v1907_v15 }
 0x554   : > { %2555 = vpow2.f32 %v1288_v32  ;;  %v1279_v33 = vpop.xlane.xlu1 %1278 }
 0x555   : > { %v1283_v34 = vsub.f32 %v1267_v19, %v1279_v33  ;;  %v1911_v27 = vsub.s32 %v1908_v20, %v1878_v17 }
 0x557   : > { %v1290_v35 = vmul.f32 1.442695, %v1283_v34 }
 0x558   : > { %v838_v43 = vpop.permute.xlu1 %837 }
 0x559   : > { %2557 = vpow2.f32 %v1290_v35  ;;  %v581_v35 = vld [vmem:[#allocation11 + $0x10] sm:$0xff] }
 0x55a   : > { %v2554_v36 = vpop.eup %2553 }
 0x55b   : > { %v1295_v37 = vsel %vm971_vm4, %v2554_v36, 0.0 }
 0x55c   : > { %1296 = vadd.xlane.f32.xlu1 %v1295_v37  ;;  %v841_v44 = vpop.permute.xlu1 %840 }
 0x55e   : > { %v2556_v38 = vpop.eup %2555 }
 0x55f   : > { %v1298_v39 = vsel %vm971_vm4, %v2556_v38, 0.0 }
 0x560   : > { %1299 = vadd.xlane.f32.xlu0 %v1298_v39 }
 0x563   : > { %v2558_v40 = vpop.eup %2557 }
 0x564   : > { %v1301_v41 = vsel %vm971_vm4, %v2558_v40, 0.0 }
 0x565   : > { %1302 = vadd.xlane.f32.xlu0 %v1301_v41 }
 0x58f   : > { %1312 = vxpose.xlu1.b32.start.end [1/1] (short) (narrow) %v812_v7, 8  ;;  %v580_v7 = vld [vmem:[#allocation11 + $0x8] sm:$0xff] }
 0x590   : > { %v2437_v8 = vpack.c.bf16 %v580_v7, %v579_v6 }
 0x592   : > { %1344 = vxpose.xlu0.b32.start.end [1/1] (short) (narrow) %v835_v42, 8 }
 0x596   : > { %1376 = vxpose.xlu0.b32.start.end [1/1] (short) (narrow) %v838_v43, 8 }
 0x59a   : > { %1408 = vxpose.xlu0.b32.start.end [1/1] (short) (narrow) %v841_v44, 8 }
 0x5a3   : > { %v1294_v45 = vpop.xlane.xlu0 %1293 }
 0x5a4   : > { %2559 = vrcp.f32 %v1294_v45 }
 0x5ae   : > { %v2560_v46 = vpop.eup %2559 }
 0x5af   : > { %v1308_v47 = vmul.f32 %v2560_v46, %v2552_v25 }
 0x5b1   : > { %2388 = vmatpush3.xpose.msk.msra.mxu0 %vm971_vm4, %v1308_v47 }
 0x5b2   : > { %2397 = vmatprep.subr.mxu0 %v2833_v18 }
 0x5e9   : > { %v1297_v48 = vpop.xlane.xlu1 %1296 }
 0x5ea   : > { %2561 = vrcp.f32 %v1297_v48 }
 0x5ed   : > { %v1300_v51 = vpop.xlane.xlu0 %1299 }
 0x5ee   : > { %2563 = vrcp.f32 %v1300_v51 }
 0x5f2   : > { %v1303_v52 = vpop.xlane.xlu0 %1302 }
 0x5f3   : > { %2565 = vrcp.f32 %v1303_v52 }
 0x5f4   : > { %v2562_v49 = vpop.eup %2561 }
 0x5f5   : > { %v1309_v50 = vmul.f32 %v2562_v49, %v2554_v36  ;;  %v582_v36 = vld [vmem:[#allocation11 + $0x18] sm:$0xff] }
 0x5f6   : > { %v2440_v41 = vpack.c.bf16 %v582_v36, %v581_v35 }
 0x5f7   : > { %2393 = vmatpush3.xpose.msk.msra.mxu1 %vm971_vm4, %v1309_v50 }
 0x5f8   : > { %2402 = vmatprep.subr.mxu1 %v2833_v18  ;;  %v2564_v53 = vpop.eup %2563 }
 0x5f9   : > { %v1310_v55 = vmul.f32 %v2564_v53, %v2556_v38 }
 0x5fd   : > { %v2566_v54 = vpop.eup %2565 }
 0x5fe   : > { %v1311_v57 = vmul.f32 %v2566_v54, %v2558_v40 }
 0x60f   : > { %v1328_v56 = vpop.trf.xlu1 }
 0x610   : > { %2390 = vmatmul.mubr.msk.f32.vlgmr.msra.gmra.mrb[4].mxu0 %vm971_vm4, %v1328_v56 }
 0x611   : > { %2398 = vmatpush3.xpose.msk.msra.mxu0 %vm971_vm4, %v1310_v55  ;;  %2399 = vmatprep.mubr.msk.f32.mxu0 %vm2832_vm1, %v2833_v18 }
 0x612   : > { %v1360_v58 = vpop.trf.xlu0  ;;  %2436 = vmatprep.subr.bf16.mxu0 %v2831_v10 }
 0x613   : > { %2395 = vmatmul.mubr.msk.f32.vlgmr.msra.gmra.mrb[10].mxu1 %vm971_vm4, %v1360_v58 }
 0x614   : > { %2403 = vmatpush3.xpose.msk.msra.mxu1 %vm971_vm4, %v1311_v57  ;;  %2404 = vmatprep.mubr.msk.f32.mxu1 %vm2832_vm1, %v2833_v18 }
 0x616   : > { %v1392_v59 = vpop.trf.xlu0 }
 0x617   : > { %2400 = vmatmul.mubr.msk.f32.vlgmr.msra.gmra.mrb[6].mxu0 %vm971_vm4, %v1392_v59 }
 0x618   : > { %2415 = vmatprep.mubr.msk.f32.mxu0 %vm2832_vm1, %v2833_v18  ;;  %2438 = vmatpush3.bf16.msra.mxu0 %v2437_v8 }
 0x619   : > { %2439 = vmatprep.subr.bf16.mxu0 %v2831_v10 }
 0x61a   : > { %v1424_v60 = vpop.trf.xlu0 }
 0x61b   : > { %2405 = vmatmul.mubr.msk.f32.vlgmr.msra.gmra.mrb[12].mxu1 %vm971_vm4, %v1424_v60 }
 0x61c   : > { %2441 = vmatpush3.bf16.msra.mxu0 %v2440_v41 }
 0x6e3   : > { %v1512_v61 = vpop.f32.mrb[4].mxu0 }
 0x6e4   : > { %1744 = vxpose.xlu1.b32.start.end [1/1] (short) (narrow) %v1512_v61, 8  ;;  %v2391_v62 = vpop.f32.mrb[5].mxu0 }
 0x6e6   : > { %v1588_v63 = vpop.f32.mrb[10].mxu1 }
 0x6e7   : > { %v2396_v1 = vpop.f32.mrb[11].mxu1  ;;  %1776 = vxpose.xlu0.b32.start.end [1/1] (short) (narrow) %v1588_v63, 8 }
 0x6ea   : > { %v1664_v2 = vpop.f32.mrb[6].mxu0 }
 0x6eb   : > { %v2401_v3 = vpop.f32.mrb[7].mxu0  ;;  %1808 = vxpose.xlu1.b32.start.end [1/1] (short) (narrow) %v1664_v2, 8 }
 0x6ee   : > { %v1740_v4 = vpop.f32.mrb[12].mxu1 }
 0x6ef   : > { %1840 = vxpose.xlu0.b32.start.end [1/1] (short) (narrow) %v1740_v4, 8  ;;  %v2406_v5 = vpop.f32.mrb[13].mxu1 }
 0x6f0   : > { %v2292_v5 = vld [vmem:[%s3416_s2] ss:$0 sm:$0xff] }
 0x764   : > { %v1760_v18 = vpop.trf.xlu1 }
 0x767   : > { %v1792_v13 = vpop.trf.xlu0 }
 0x76b   : > { %v1824_v19 = vpop.trf.xlu1 }
 0x76c   : > { %v1872_v22 = vcombine.low %v1760_v18, %v1824_v19  ;;  %v1873_v23 = vcombine.high %v1760_v18, %v1824_v19 }
 0x76e   : > { %v1880_v28 = vrot.slane %v1872_v22, %v1879_v21  ;;  %v1887_v10 = vrot.slane %v1873_v23, %v1879_v21 }
 0x76f   : > { %v1856_v24 = vpop.trf.xlu0 }
 0x770   : > { %v1888_v25 = vcombine.low %v1792_v13, %v1856_v24  ;;  %v1889_v26 = vcombine.high %v1792_v13, %v1856_v24 }
 0x772   : > { %v1896_v29 = vrot.slane %v1888_v25, %v1879_v21  ;;  %v1903_v30 = vrot.slane %v1889_v26, %v1879_v21 }
 0x774   : > { %v1904_v31 = vcombine.low %v1880_v28, %v1896_v29  ;;  %v1905_v32 = vcombine.high %v1880_v28, %v1896_v29  ;;  %v1920_v33 = vcombine.low %v1887_v10, %v1903_v30  ;;  %v1921_v34 = vcombine.high %v1887_v10, %v1903_v30 }
 0x776   : > { %v1912_v37 = vrot.slane %v1904_v31, %v1911_v27  ;;  %v1919_v38 = vrot.slane %v1905_v32, %v1911_v27  ;;  %v1928_v39 = vrot.slane %v1920_v33, %v1911_v27  ;;  %v1935_v40 = vrot.slane %v1921_v34, %v1911_v27 }
 0x778   : > { %v1940_v42 = vcombine.low %v1912_v37, %v1919_v38  ;;  %v2290_v43 = vcombine.high %v1912_v37, %v1919_v38  ;;  %v1956_v44 = vcombine.low %v1928_v39, %v1935_v40  ;;  %v2291_v45 = vcombine.high %v1928_v39, %v1935_v40 }
 0x77a   : > { %v1947_v46 = vrot.slane %v1940_v42, %v1879_v21  ;;  %v1955_v47 = vrot.slane %v2290_v43, %v1879_v21  ;;  %v1963_v48 = vrot.slane %v1956_v44, %v1879_v21  ;;  %v1971_v49 = vrot.slane %v2291_v45, %v1879_v21 }
 0x77c   : > { %v1973_v50 = vcombine.high %v1947_v46, %v1955_v47  ;;  %v1989_v51 = vcombine.high %v1963_v48, %v1971_v49  ;;  %v1972_v52 = vcombine.low %v1947_v46, %v1955_v47  ;;  %v1988_v53 = vcombine.low %v1963_v48, %v1971_v49 }
 0x77e   : > { %v1987_v54 = vrot.slane %v1973_v50, %v1911_v27  ;;  %v2003_v55 = vrot.slane %v1989_v51, %v1911_v27  ;;  %v1980_v56 = vrot.slane %v1972_v52, %v1911_v27  ;;  %v1996_v57 = vrot.slane %v1988_v53, %v1911_v27 }
 0x780   : > { %v2006_v58 = vcombine.low %v1987_v54, %v2003_v55  ;;  %v2005_v59 = vcombine.high %v1980_v56, %v1996_v57  ;;  %v2004_v60 = vcombine.low %v1980_v56, %v1996_v57  ;;  %v2007_v61 = vcombine.high %v1987_v54, %v2003_v55 }
 0x782   : > { %2013 = vrot.lane.b32.xlu0 %v2006_v58, %s2839_s14  ;;  %2009 = vrot.lane.b32.xlu1 %v2005_v59, %s2840_s15  ;;  %s2745_s14 = scalar_lea.vmem %s2744_s17, 256 }
 0x783   : > { %p2747_p7 = scmp.lt.s32.totalorder %s2745_s14, %s2739_s7 }
 0x785   : > { %p2748_p8 = por %p2747_p7, %p2746_p5 }
 0x786   : > { %2017 = vrot.lane.b32.xlu1 %v2007_v61, %s2841_s30 }
 0x787   : > { %p2749_p6 = pnand %p2748_p8, %p2742_p10 }
 0x7f4   : > { %v2010_v62 = vpop.permute.xlu1 %2009  ;;  %v2014_v63 = vpop.permute.xlu0 %2013 }
 0x7f5   : > { %v2020_v1 = vsel %vm971_vm4, %v2004_v60, %v2010_v62 }
 0x7f6   : > { %v2022_v3 = vsel %vm2021_vm6, %v2020_v1, %v2014_v63 }
 0x7f8   : > { %v2018_v2 = vpop.permute.xlu1 %2017 }
 0x7f9   : > { %v2024_v4 = vsel %vm2023_vm7, %v2022_v3, %v2018_v2 }
 0x7fa   : > { %2416 = vmatmul.mubr.msk.f32.vlgmr.msra.gmra.mrb[8].mxu0 %vm527_vm0, %v2024_v4 }
 0x8cd   : > { %v2100_v6 = vpop.f32.mrb[8].mxu0 }
 0x8ce   : > { %v2101_v7 = vadd.f32 %v2292_v5, %v2100_v6  ;;  %v2417_v8 = vpop.f32.mrb[9].mxu0 }
 0x8d0   : > { %v2104_v18 = vadd.f32 %v2101_v7, %v3201_v0 }
 0x8d2   : > { %2105 = vst.msk [vmem:[%s523_s3] sm:$0xff] %vm527_vm0, %v2104_v18 }
 0x8d3   : > { %2752 = shalt.err (!%p2749_p6)
}
 0x8d4   : > { %s2753_s6 = scalar_lea.hbm %s3319_s28, 128  ;;  %s2757_s18 = scalar_lea.hbm %s3417_s0, 256 }
 0x8d5   : > { %p2754_p11 = scmp.ne.s32.totalorder %s3319_s28, %s2753_s6  ;;  %p2758_p12 = scmp.lt.u32.totalorder %s3319_s28, %s3417_s0 }
 0x8d6   : > { %p2759_p3 = scmp.lt.u32.totalorder %s2757_s18, %s2753_s6  ;;  %p2761_p0 = scmp.lt.u32.totalorder %s2753_s6, %s3319_s28 }
 0x8d7   : > { %p2755_p1 = pnand %p2754_p11, %p3418_p2 }
 0x8d8   : > { %p2760_p13 = por %p2759_p3, %p2758_p12 }
 0x8d9   : > { %p2756_p9 = pneg %p2755_p1 }
 0x8da   : > { %p2762_p4 = por %p2761_p0, %p2760_p13 }
 0x8dc   : > { %p2763_p10 = pnand %p2762_p4, %p2756_p9 }
 0x8de   : > { %2766 = shalt.err (!%p2763_p10)
}
 0x8df   : > { %2462 = dma.vmem_to_hbm [thread:$0]  (%p3418_p2), %s3321_s12, 128, %s3319_s28, %s2107_s27  }
 0x8e0 PF: > { %s2132_s20 = sand.u32 1, %s2809_s21   ;;  %p3419_p5 = scmp.ne.s32.totalorder %s3400_s29, 0 }
 0x8e1   : > { %p3420_p7 = scmp.ge.s32.totalorder %s2821_s24, 2  ;;  %s2133_s3 = scalar_lea.sflag [#allocation4], %s2132_s20 }
 0x8e3   : > { %p2485_p8 = pnand %p3420_p7, %p3419_p5 }
 0x8e5   : > { %2804 = dma.done.wait (!%p2485_p8), %s2133_s3, 128  }
 0x8e6   : > { %2806 = vsyncadd (!%p2485_p8), %s2133_s3, 4294967168  ;;  %p30_p6 = scmp.ge.s32.totalorder %s3060_s25, 4   ;;  %s3421_s21 = smov %s2813_s22 }
 0x8e7   : > { %s3422_s22 = smov %s2817_s23  ;;  %s3423_s23 = smov %s3071_s19 }
 0x8e8   : > { %s3424_s24 = smov %s3060_s25  ;;  %32 = sbr.rel (!%p30_p6) target bundleno = 18 (0x12), region = 142 }
 0x8ef   :  { %2138 = vsyncpa [#allocation3], 1 }
 0x8f0   :  { %2140 = vsyncpa [#allocation3 + $0x1], 1 }
 0x8f1   :  { %2141 = vsyncpa [#allocation6], 1 }
 0x8f2   :  { %2143 = vsyncpa [#allocation6 + $0x1], 1 }
 0x8f3   :  { %2144 = vsyncpa [#allocation9], 1 }
 0x8f4   :  { %2145 = vsyncpa [#allocation12], 1 }
 0x8f5   :  { %2146 = vsyncpa [#allocation4], 1 }
 0x8f6   :  { %2148 = vsyncpa [#allocation4 + $0x1], 1 }

</bundles_post_ra>
